<compile_context>
chip_gen: v6e
topology: v6e:2x2x1
jax: 0.10.0
libtpu: 0.0.40
codegen_flags: <defaults>
</compile_context>

<pallas_src>
import numpy as np
import jax
import jax.numpy as jnp
from jax.experimental import pallas as pl
from jax.experimental.pallas import tpu as pltpu

# Scaled-down, TPU-tile-friendly analogue of the module's default geometry
# (patch=196x256 stride=98x128): patch rows = 2 * stride rows; column strips
# tile the padded width with no overlap and lane-aligned (128) edges.
PATCH_H = 16
PATCH_W = 128
STRIDE_H = 8
STRIDE_W = 128
BATCH_SIZE = 4  # torch-side batching detail only; patches are independent.

# The boundary-correction identity in the kernel relies on exactly this
# geometry; fail loudly if the constants are ever changed inconsistently.
assert PATCH_H == 2 * STRIDE_H, "kernel assumes patch rows == 2 * stride rows"
assert PATCH_W == STRIDE_W, "kernel assumes non-overlapping column strips"
assert PATCH_W % 128 == 0, "strip edges must be lane aligned"


def _patch_conv_kernel(x_ref, w_ref, out_ref):
    """One (h_pad, block_w) slab: strip-wide 3x3 conv + patch-boundary fixups.

    For every 128-lane column strip the per-patch zero padding coincides with
    the strip edges.  For rows, overlap-add followed by division by the visit
    count is the identity except:
      * a row that is the TOP of an interior patch is missing half of its
        dy = -1 contribution  -> scale the "row above" term by 0.5,
      * a row that is the BOTTOM of an interior patch is missing half of its
        dy = +1 contribution  -> scale the "row below" term by 0.5,
      * the strip's first/last row has no row above/below at all (0.0).
    The bias is added exactly once (bias * visits / visits == bias).
    """
    h_pad, bw = out_ref.shape
    x = x_ref[...]

    w = [w_ref[k] for k in range(9)]      # row-major 3x3 kernel (SMEM scalars)
    bias = w_ref[9]

    # ---- horizontal (lane) taps: shared masked neighbours, per-strip zero pad.
    lane = jax.lax.broadcasted_iota(jnp.int32, (h_pad, bw), 1) % PATCH_W
    left_nb = jnp.where(lane > 0, pltpu.roll(x, 1, 1), 0.0)                   # x[r, c-1]
    right_nb = jnp.where(lane < PATCH_W - 1, pltpu.roll(x, bw - 1, 1), 0.0)   # x[r, c+1]

    h_m1 = w[0] * left_nb + w[1] * x + w[2] * right_nb    # kernel row ky=0 (dy=-1)
    h_0 = w[3] * left_nb + w[4] * x + w[5] * right_nb     # ky=1 (dy= 0)
    h_p1 = w[6] * left_nb + w[7] * x + w[8] * right_nb    # ky=2 (dy=+1)

    # ---- vertical (sublane) taps + overlap/visit identity.
    down = pltpu.roll(h_m1, 1, 0)           # row r sees h_m1[r-1]
    up = pltpu.roll(h_p1, h_pad - 1, 0)     # row r sees h_p1[r+1]

    row = jax.lax.broadcasted_iota(jnp.int32, (h_pad, bw), 0)
    is_patch_top = (row % STRIDE_H == 0) & (row <= h_pad - PATCH_H)
    is_patch_bot = ((row % STRIDE_H == STRIDE_H - 1)
                    & (row >= PATCH_H - 1) & (row <= h_pad - STRIDE_H - 1))
    a_top = jnp.where(row == 0, 0.0, jnp.where(is_patch_top, 0.5, 1.0))
    a_bot = jnp.where(row == h_pad - 1, 0.0, jnp.where(is_patch_bot, 0.5, 1.0))

    # Single store pass: conv + boundary fixups + bias.  No RMW, no epilogue.
    out_ref[...] = h_0 + a_top * down + a_bot * up + bias


def _choose_block_w(h_pad, w_pad):
    """Lane-dense block width: big blocks, but >= 2 grid steps (v7x dual TC)
    and <= ~1 MiB per block array (safe under v5e's 16 MiB scoped VMEM)."""
    n_strips = w_pad // PATCH_W
    max_strips_vmem = max(1, (1 << 20) // (h_pad * PATCH_W * 4))
    strips = min(n_strips, max_strips_vmem, max(1, n_strips // 2))
    while n_strips % strips:
        strips -= 1
    return strips * PATCH_W


def _run_patch_kernel(x_padded, wvec):
    h_pad, w_pad = x_padded.shape
    block_w = _choose_block_w(h_pad, w_pad)
    n_blocks = w_pad // block_w

    # in + out double-buffered blocks plus a handful of live intermediates.
    block_bytes = h_pad * block_w * 4
    vmem_limit = int(min(max(4 << 20, 12 * block_bytes), 64 << 20))

    grid_spec = pltpu.PrefetchScalarGridSpec(
        num_scalar_prefetch=0,
        grid=(n_blocks,),
        in_specs=[
            pl.BlockSpec((h_pad, block_w), lambda j: (0, j)),        # image slab
            pl.BlockSpec(memory_space=pltpu.MemorySpace.SMEM),       # 3x3 w + bias
        ],
        out_specs=pl.BlockSpec((h_pad, block_w), lambda j: (0, j)),
    )
    return pl.pallas_call(
        _patch_conv_kernel,
        out_shape=jax.ShapeDtypeStruct((h_pad, w_pad), jnp.float32),
        grid_spec=grid_spec,
        compiler_params=pltpu.CompilerParams(
            # Column blocks are disjoint -> safe to shard across TensorCores.
            dimension_semantics=("parallel",),
            vmem_limit_bytes=vmem_limit,
        ),
    )(x_padded, wvec)


def _padded_shape(h, w):
    unit_h = PATCH_H + STRIDE_H
    unit_w = PATCH_W + STRIDE_W
    h_pad = int(np.ceil(h / unit_h) * unit_h)
    w_pad = int(np.ceil(w / unit_w) * unit_w)
    return h_pad, w_pad


def patch_analyzer_forward(x, conv_w, conv_b):
    """PatchAnalyzer.forward with net = Conv2d(1, 1, 3, padding=1)."""
    x = jnp.asarray(x)
    if x.ndim == 4:
        assert x.shape[0] == 1 and x.shape[1] == 1, "PatchAnalyzer needs b == c == 1"
        img = x[0, 0]
    elif x.ndim == 3:
        assert x.shape[0] == 1, "PatchAnalyzer needs c == 1"
        img = x[0]
    elif x.ndim == 2:
        img = x
    else:
        raise ValueError(f"unsupported input rank {x.ndim}")
    img = img.astype(jnp.float32)

    h, w = img.shape
    h_pad, w_pad = _padded_shape(h, w)
    pad_h, pad_w = h_pad - h, w_pad - w
    # torch ReflectionPad2d (and jnp mode="reflect") require pad < dim.
    if pad_h >= h or pad_w >= w:
        raise ValueError("reflection padding exceeds input size "
                         f"(pad=({pad_h},{pad_w}), image=({h},{w}))")
    padded = jnp.pad(img, ((0, pad_h), (0, pad_w)), mode="reflect")

    wvec = jnp.concatenate([
        jnp.asarray(conv_w, jnp.float32).reshape(-1),
        jnp.asarray(conv_b, jnp.float32).reshape(-1),
    ])  # (10,) : w00..w22, bias

    out_padded = _run_patch_kernel(padded, wvec)
    return out_padded[:h, :w]
    # TODO(synk): the bsize-grouped net calls of the torch code are a pure
    # batching detail (patches are processed independently) and are not
    # reproduced.


def _reference_forward(x, kw, kb):
    """Pure numpy translation of PatchAnalyzer.forward for verification."""
    img = np.asarray(np.squeeze(x), np.float32)
    h, w = img.shape
    h_pad, w_pad = _padded_shape(h, w)
    padded = np.pad(img, ((0, h_pad - h), (0, w_pad - w)), mode="reflect")
    acc = np.zeros_like(padded)
    vis = np.zeros_like(padded)
    for r0 in range(0, h_pad - PATCH_H + 1, STRIDE_H):
        for c0 in range(0, w_pad - PATCH_W + 1, STRIDE_W):
            patch = padded[r0:r0 + PATCH_H, c0:c0 + PATCH_W]
            pp = np.zeros((PATCH_H + 2, PATCH_W + 2), np.float32)
            pp[1:-1, 1:-1] = patch
            conv = np.zeros((PATCH_H, PATCH_W), np.float32)
            for ky in range(3):
                for kx in range(3):
                    conv += kw[ky, kx] * pp[ky:ky + PATCH_H, kx:kx + PATCH_W]
            conv += kb
            acc[r0:r0 + PATCH_H, c0:c0 + PATCH_W] += conv
            vis[r0:r0 + PATCH_H, c0:c0 + PATCH_W] += 1.0
    out = acc / vis
    return out[:h, :w]


if __name__ == "__main__":
    key = jax.random.PRNGKey(0)
    k_img, k_w = jax.random.split(key)

    # NCHW input, b == c == 1 as required by the module.
    x = jax.random.normal(k_img, (1, 1, 40, 300), jnp.float32)

    # Deterministic synthetic "net" parameters: Conv2d(1, 1, 3, padding=1).
    conv_w = jax.random.normal(k_w, (3, 3), jnp.float32) * 0.3
    conv_b = jnp.array([0.05], jnp.float32)

    out = patch_analyzer_forward(x, conv_w, conv_b)
    out = jax.block_until_ready(out)

    ref = _reference_forward(np.asarray(x), np.asarray(conv_w), float(conv_b[0]))
    np.testing.assert_allclose(np.asarray(out), ref, rtol=1e-5, atol=1e-5)
    assert out.shape == (40, 300)

    print("KERNEL_OK")
</pallas_src>

<mosaic_0001>
module attributes {stable_mosaic.version = 11 : i64} {
  func.func @_patch_conv_kernel(%arg0: i32, %arg1: memref<48x256xf32, #tpu.memory_space<vmem>>, %arg2: memref<10xf32, #tpu.memory_space<smem>>, %arg3: memref<48x256xf32, #tpu.memory_space<vmem>>) attributes {dimension_semantics = [#tpu.dimension_semantics<parallel>], iteration_bounds = array<i64: 2>, scalar_prefetch = 0 : i64, scratch_operands = 0 : i64, tpu.core_type = #tpu.core_type<tc>, window_params = [{transform_indices = @transform_0, window_bounds = array<i64: 48, 256>}, {transform_indices = @transform_1, window_bounds = array<i64: 10>}, {transform_indices = @transform_2, window_bounds = array<i64: 48, 256>}]} {
    %c0 = arith.constant 0 : index
    %c0_0 = arith.constant 0 : index
    %0 = vector.load %arg1[%c0, %c0_0] : memref<48x256xf32, #tpu.memory_space<vmem>>, vector<48x256xf32>
    %c0_1 = arith.constant 0 : index
    %1 = memref.load %arg2[%c0_1] : memref<10xf32, #tpu.memory_space<smem>>
    %c1 = arith.constant 1 : index
    %2 = memref.load %arg2[%c1] : memref<10xf32, #tpu.memory_space<smem>>
    %c2 = arith.constant 2 : index
    %3 = memref.load %arg2[%c2] : memref<10xf32, #tpu.memory_space<smem>>
    %c3 = arith.constant 3 : index
    %4 = memref.load %arg2[%c3] : memref<10xf32, #tpu.memory_space<smem>>
    %c4 = arith.constant 4 : index
    %5 = memref.load %arg2[%c4] : memref<10xf32, #tpu.memory_space<smem>>
    %c5 = arith.constant 5 : index
    %6 = memref.load %arg2[%c5] : memref<10xf32, #tpu.memory_space<smem>>
    %c6 = arith.constant 6 : index
    %7 = memref.load %arg2[%c6] : memref<10xf32, #tpu.memory_space<smem>>
    %c7 = arith.constant 7 : index
    %8 = memref.load %arg2[%c7] : memref<10xf32, #tpu.memory_space<smem>>
    %c8 = arith.constant 8 : index
    %9 = memref.load %arg2[%c8] : memref<10xf32, #tpu.memory_space<smem>>
    %c9 = arith.constant 9 : index
    %10 = memref.load %arg2[%c9] : memref<10xf32, #tpu.memory_space<smem>>
    %11 = tpu.iota {dimensions = array<i32: 1>} : vector<48x256xi32>
    %c128_i32 = arith.constant 128 : i32
    %c0_i32 = arith.constant 0 : i32
    %12 = arith.cmpi eq, %c128_i32, %c0_i32 : i32
    %c1_i32 = arith.constant 1 : i32
    %13 = arith.select %12, %c1_i32, %c128_i32 : i32
    %14 = vector.broadcast %13 : i32 to vector<48x256xi32>
    %15 = arith.remsi %11, %14 : vector<48x256xi32>
    %c0_i32_2 = arith.constant 0 : i32
    %16 = vector.broadcast %c0_i32_2 : i32 to vector<48x256xi32>
    %17 = arith.cmpi ne, %15, %16 : vector<48x256xi32>
    %c0_i32_3 = arith.constant 0 : i32
    %18 = vector.broadcast %c0_i32_3 : i32 to vector<48x256xi32>
    %19 = arith.cmpi slt, %15, %18 : vector<48x256xi32>
    %c0_i32_4 = arith.constant 0 : i32
    %20 = arith.cmpi slt, %13, %c0_i32_4 : i32
    %21 = vector.broadcast %20 : i1 to vector<48x256xi1>
    %22 = vector.broadcast %21 : vector<48x256xi1> to vector<48x256xi1>
    %23 = arith.xori %19, %22 : vector<48x256xi1>
    %24 = arith.andi %23, %17 : vector<48x256xi1>
    %25 = vector.broadcast %13 : i32 to vector<48x256xi32>
    %26 = arith.addi %15, %25 : vector<48x256xi32>
    %27 = arith.select %24, %26, %15 : vector<48x256xi1>, vector<48x256xi32>
    %c0_i32_5 = arith.constant 0 : i32
    %28 = vector.broadcast %c0_i32_5 : i32 to vector<48x256xi32>
    %29 = arith.cmpi sgt, %27, %28 : vector<48x256xi32>
    %c1_i32_6 = arith.constant 1 : i32
    %30 = tpu.dynamic_rotate %0 by %c1_i32_6 dim 1 : vector<48x256xf32>, i32 -> vector<48x256xf32>
    %cst = arith.constant 0.000000e+00 : f32
    %31 = vector.broadcast %cst : f32 to vector<48x256xf32>
    %32 = arith.select %29, %30, %31 : vector<48x256xi1>, vector<48x256xf32>
    %c127_i32 = arith.constant 127 : i32
    %33 = vector.broadcast %c127_i32 : i32 to vector<48x256xi32>
    %34 = arith.cmpi slt, %27, %33 : vector<48x256xi32>
    %c255_i32 = arith.constant 255 : i32
    %35 = tpu.dynamic_rotate %0 by %c255_i32 dim 1 : vector<48x256xf32>, i32 -> vector<48x256xf32>
    %cst_7 = arith.constant 0.000000e+00 : f32
    %36 = vector.broadcast %cst_7 : f32 to vector<48x256xf32>
    %37 = arith.select %34, %35, %36 : vector<48x256xi1>, vector<48x256xf32>
    %38 = vector.broadcast %1 : f32 to vector<48x256xf32>
    %39 = arith.mulf %38, %32 : vector<48x256xf32>
    %40 = vector.broadcast %2 : f32 to vector<48x256xf32>
    %41 = arith.mulf %40, %0 : vector<48x256xf32>
    %42 = arith.addf %39, %41 : vector<48x256xf32>
    %43 = vector.broadcast %3 : f32 to vector<48x256xf32>
    %44 = arith.mulf %43, %37 : vector<48x256xf32>
    %45 = arith.addf %42, %44 : vector<48x256xf32>
    %46 = vector.broadcast %4 : f32 to vector<48x256xf32>
    %47 = arith.mulf %46, %32 : vector<48x256xf32>
    %48 = vector.broadcast %5 : f32 to vector<48x256xf32>
    %49 = arith.mulf %48, %0 : vector<48x256xf32>
    %50 = arith.addf %47, %49 : vector<48x256xf32>
    %51 = vector.broadcast %6 : f32 to vector<48x256xf32>
    %52 = arith.mulf %51, %37 : vector<48x256xf32>
    %53 = arith.addf %50, %52 : vector<48x256xf32>
    %54 = vector.broadcast %7 : f32 to vector<48x256xf32>
    %55 = arith.mulf %54, %32 : vector<48x256xf32>
    %56 = vector.broadcast %8 : f32 to vector<48x256xf32>
    %57 = arith.mulf %56, %0 : vector<48x256xf32>
    %58 = arith.addf %55, %57 : vector<48x256xf32>
    %59 = vector.broadcast %9 : f32 to vector<48x256xf32>
    %60 = arith.mulf %59, %37 : vector<48x256xf32>
    %61 = arith.addf %58, %60 : vector<48x256xf32>
    %c1_i32_8 = arith.constant 1 : i32
    %62 = tpu.dynamic_rotate %45 by %c1_i32_8 dim 0 : vector<48x256xf32>, i32 -> vector<48x256xf32>
    %c47_i32 = arith.constant 47 : i32
    %63 = tpu.dynamic_rotate %61 by %c47_i32 dim 0 : vector<48x256xf32>, i32 -> vector<48x256xf32>
    %64 = tpu.iota {dimensions = array<i32: 0>} : vector<48x256xi32>
    %c8_i32 = arith.constant 8 : i32
    %c0_i32_9 = arith.constant 0 : i32
    %65 = arith.cmpi eq, %c8_i32, %c0_i32_9 : i32
    %c1_i32_10 = arith.constant 1 : i32
    %66 = arith.select %65, %c1_i32_10, %c8_i32 : i32
    %67 = vector.broadcast %66 : i32 to vector<48x256xi32>
    %68 = arith.remsi %64, %67 : vector<48x256xi32>
    %c0_i32_11 = arith.constant 0 : i32
    %69 = vector.broadcast %c0_i32_11 : i32 to vector<48x256xi32>
    %70 = arith.cmpi ne, %68, %69 : vector<48x256xi32>
    %c0_i32_12 = arith.constant 0 : i32
    %71 = vector.broadcast %c0_i32_12 : i32 to vector<48x256xi32>
    %72 = arith.cmpi slt, %68, %71 : vector<48x256xi32>
    %c0_i32_13 = arith.constant 0 : i32
    %73 = arith.cmpi slt, %66, %c0_i32_13 : i32
    %74 = vector.broadcast %73 : i1 to vector<48x256xi1>
    %75 = vector.broadcast %74 : vector<48x256xi1> to vector<48x256xi1>
    %76 = arith.xori %72, %75 : vector<48x256xi1>
    %77 = arith.andi %76, %70 : vector<48x256xi1>
    %78 = vector.broadcast %66 : i32 to vector<48x256xi32>
    %79 = arith.addi %68, %78 : vector<48x256xi32>
    %80 = arith.select %77, %79, %68 : vector<48x256xi1>, vector<48x256xi32>
    %c0_i32_14 = arith.constant 0 : i32
    %81 = vector.broadcast %c0_i32_14 : i32 to vector<48x256xi32>
    %82 = arith.cmpi eq, %80, %81 : vector<48x256xi32>
    %c32_i32 = arith.constant 32 : i32
    %83 = vector.broadcast %c32_i32 : i32 to vector<48x256xi32>
    %84 = arith.cmpi sle, %64, %83 : vector<48x256xi32>
    %85 = arith.andi %82, %84 : vector<48x256xi1>
    %c8_i32_15 = arith.constant 8 : i32
    %c0_i32_16 = arith.constant 0 : i32
    %86 = arith.cmpi eq, %c8_i32_15, %c0_i32_16 : i32
    %c1_i32_17 = arith.constant 1 : i32
    %87 = arith.select %86, %c1_i32_17, %c8_i32_15 : i32
    %88 = vector.broadcast %87 : i32 to vector<48x256xi32>
    %89 = arith.remsi %64, %88 : vector<48x256xi32>
    %c0_i32_18 = arith.constant 0 : i32
    %90 = vector.broadcast %c0_i32_18 : i32 to vector<48x256xi32>
    %91 = arith.cmpi ne, %89, %90 : vector<48x256xi32>
    %c0_i32_19 = arith.constant 0 : i32
    %92 = vector.broadcast %c0_i32_19 : i32 to vector<48x256xi32>
    %93 = arith.cmpi slt, %89, %92 : vector<48x256xi32>
    %c0_i32_20 = arith.constant 0 : i32
    %94 = arith.cmpi slt, %87, %c0_i32_20 : i32
    %95 = vector.broadcast %94 : i1 to vector<48x256xi1>
    %96 = vector.broadcast %95 : vector<48x256xi1> to vector<48x256xi1>
    %97 = arith.xori %93, %96 : vector<48x256xi1>
    %98 = arith.andi %97, %91 : vector<48x256xi1>
    %99 = vector.broadcast %87 : i32 to vector<48x256xi32>
    %100 = arith.addi %89, %99 : vector<48x256xi32>
    %101 = arith.select %98, %100, %89 : vector<48x256xi1>, vector<48x256xi32>
    %c7_i32 = arith.constant 7 : i32
    %102 = vector.broadcast %c7_i32 : i32 to vector<48x256xi32>
    %103 = arith.cmpi eq, %101, %102 : vector<48x256xi32>
    %c15_i32 = arith.constant 15 : i32
    %104 = vector.broadcast %c15_i32 : i32 to vector<48x256xi32>
    %105 = arith.cmpi sge, %64, %104 : vector<48x256xi32>
    %106 = arith.andi %103, %105 : vector<48x256xi1>
    %c39_i32 = arith.constant 39 : i32
    %107 = vector.broadcast %c39_i32 : i32 to vector<48x256xi32>
    %108 = arith.cmpi sle, %64, %107 : vector<48x256xi32>
    %109 = arith.andi %106, %108 : vector<48x256xi1>
    %c0_i32_21 = arith.constant 0 : i32
    %110 = vector.broadcast %c0_i32_21 : i32 to vector<48x256xi32>
    %111 = arith.cmpi eq, %64, %110 : vector<48x256xi32>
    %cst_22 = arith.constant 5.000000e-01 : f32
    %cst_23 = arith.constant 1.000000e+00 : f32
    %112 = vector.broadcast %cst_22 : f32 to vector<48x256xf32>
    %113 = vector.broadcast %cst_23 : f32 to vector<48x256xf32>
    %114 = arith.select %85, %112, %113 : vector<48x256xi1>, vector<48x256xf32>
    %cst_24 = arith.constant 0.000000e+00 : f32
    %115 = vector.broadcast %cst_24 : f32 to vector<48x256xf32>
    %116 = arith.select %111, %115, %114 : vector<48x256xi1>, vector<48x256xf32>
    %c47_i32_25 = arith.constant 47 : i32
    %117 = vector.broadcast %c47_i32_25 : i32 to vector<48x256xi32>
    %118 = arith.cmpi eq, %64, %117 : vector<48x256xi32>
    %cst_26 = arith.constant 5.000000e-01 : f32
    %cst_27 = arith.constant 1.000000e+00 : f32
    %119 = vector.broadcast %cst_26 : f32 to vector<48x256xf32>
    %120 = vector.broadcast %cst_27 : f32 to vector<48x256xf32>
    %121 = arith.select %109, %119, %120 : vector<48x256xi1>, vector<48x256xf32>
    %cst_28 = arith.constant 0.000000e+00 : f32
    %122 = vector.broadcast %cst_28 : f32 to vector<48x256xf32>
    %123 = arith.select %118, %122, %121 : vector<48x256xi1>, vector<48x256xf32>
    %124 = arith.mulf %116, %62 : vector<48x256xf32>
    %125 = arith.addf %53, %124 : vector<48x256xf32>
    %126 = arith.mulf %123, %63 : vector<48x256xf32>
    %127 = arith.addf %125, %126 : vector<48x256xf32>
    %128 = vector.broadcast %10 : f32 to vector<48x256xf32>
    %129 = arith.addf %127, %128 : vector<48x256xf32>
    %c0_29 = arith.constant 0 : index
    %c0_30 = arith.constant 0 : index
    %130 = vector.load %arg3[%c0_29, %c0_30] : memref<48x256xf32, #tpu.memory_space<vmem>>, vector<48x256xf32>
    tpu.vector_store %arg3[%c0_29, %c0_30], %129 {strides = array<i32>} : memref<48x256xf32, #tpu.memory_space<vmem>>, vector<48x256xf32>,
    return
  }
  func.func @transform_0(%arg0: i32) -> (i32, i32) {
    %c0_i32 = arith.constant 0 : i32
    %c0_i32_0 = arith.constant 0 : i32
    return %c0_i32, %arg0 : i32, i32
  }
  func.func @transform_1(%arg0: i32) -> i32 {
    %c0_i32 = arith.constant 0 : i32
    %c0_i32_0 = arith.constant 0 : i32
    return %c0_i32 : i32
  }
  func.func @transform_2(%arg0: i32) -> (i32, i32) {
    %c0_i32 = arith.constant 0 : i32
    %c0_i32_0 = arith.constant 0 : i32
    return %c0_i32, %arg0 : i32, i32
  }
}

</mosaic_0001>

<bundles_post_ra>
// kernel: tpu_custom_call.1
= control target key start
LH: loop header
LB: loop body
LE: loop exit
PB: predicated region body
PF: predicated region fallthrough
CT: control target
= control target key end

     0   :  { %7 = vsyncpa [#allocation3], 0  ;;  %s2115_s0 = inlined_call_operand.hbm [shape: f32[48,512], index: 0, kind: input, shape index: {}]   ;;  %s2116_s1 = inlined_call_operand.vmem [shape: f32[10], index: 1, kind: input, shape index: {}]   ;;  %s2117_s2 = inlined_call_operand.hbm [shape: f32[48,512], index: 2, kind: output, shape index: {}]  }
   0x1   :  { %9 = vsyncpa [#allocation3 + $0x1], 0 }
   0x2   :  { %10 = vsyncpa [#allocation5], 0 }
   0x3   :  { %11 = vsyncpa [#allocation4], 0 }
   0x4   :  { %13 = vsyncpa [#allocation4 + $0x1], 0  ;;  %s1134_s9 = smov 0   ;;  %s1136_s10 = smov 0  }
   0x5   :  { %s1138_s11 = smov 0   ;;  %s1140_s12 = smov 0  }
   0x6 LB: > { %s1155_s13 = sadd.s32 4294967295, %s1105_s12   ;;  %s903_s14 = sadd.s32 4294967294, %s1105_s12   ;;  %s1105_s12 = sphi %s1140_s12, %s2233_s12   ;;  %s1101_s11 = sphi %s1138_s11, %s2232_s11   ;;  %s1097_s10 = sphi %s1136_s10, %s2231_s10   ;;  %s1093_s9 = sphi %s1134_s9, %s2230_s9  }
   0x7   : > { %s1159_s15 = sadd.s32 1, %s1105_s12   ;;  %s26_s16 = sadd.s32 1, %s1101_s11 }
   0x8   : > { %s23_s17 = ssub.s32 %s1105_s12, %s1159_s15  ;;  %p33_p0 = scmp.ne.s32.totalorder %s1101_s11, %s1097_s10 }
   0x9   : > { %p24_p1 = scmp.eq.s32.totalorder %s23_s17, 0  ;;  %p34_p2 = scmp.eq.s32.totalorder %s1105_s12, 0 }
   0xa   : > { %p39_p3 = scmp.ne.s32.totalorder %s1097_s10, %s1093_s9  ;;  %p2119_p4 = scmp.eq.s32.totalorder %s1155_s13, 0 }
   0xb   : > { %s1171_s18 = scalar_select %p24_p1, %s1101_s11, %s26_s16  }
   0xc   : > { %p1173_p5 = por %p34_p2, %p33_p0  ;;  %p1179_p6 = por %p2119_p4, %p39_p3 }
   0xd   : > { %p84_p7 = scmp.eq.s32.totalorder %s1155_s13, 1  ;;  %p90_p8 = scmp.eq.s32.totalorder %s903_s14, 1 }
   0xe   : > { %s2150_s20 = scalar_select %p1179_p6, 1, 0 }
   0xf   : > { %p904_p9 = scmp.ge.s32.totalorder %s1105_s12, 1  ;;  %p97_p10 = scmp.lt.s32.totalorder %s1105_s12, 3 }
  0x10   : > { %p1186_p11 = por %p84_p7, %p33_p0  ;;  %p1190_p12 = por %p90_p8, %p39_p3 }
  0x11   : > { %p1194_p13 = pnand %p904_p9, %p97_p10  ;;  %s110_s26 = sshll.u32 %s2116_s1, 4  ;;  %s111_s26 = int_to_ptr.vmem [resolvable:$true] %s110_s26 }
  0x12   : > { %s2151_s21 = scalar_select %p1186_p11, 1, 0 }
  0x13   : > { %s2152_s22 = scalar_select %p1190_p12, 1, 0 }
  0x14   : > { %s2153_s23 = scalar_select %p1194_p13, 1, 0 }
  0x15   : > { %p936_p1 = pneg %p1194_p13  ;;  %p949_p2 = scmp.lt.s32.totalorder %s1105_s12, 2 }
  0x16   : > { %s121_s28 = sand.u32 1, %s1101_s11   ;;  %s994_s3 = scalar_lea.vmem %s111_s26, 16 }
  0x17   : > { %p1207_p7 = pnand %p936_p1, %p2119_p4  ;;  %p1214_p3 = pnand %p949_p2, %p1173_p5 }
  0x18   : > { %s926_s30 = smul.u32 96, %s121_s28  ;;  %p995_p8 = scmp.ne.s32.totalorder %s111_s26, %s994_s3 }
  0x19   : > { %p996_p9 = pneg %p1207_p7  ;;  %p1002_p12 = scmp.lt.s32.totalorder %s111_s26, %s111_s26 }
  0x1a   : > { %p1003_p11 = scmp.lt.s32.totalorder %s994_s3, %s994_s3 }
  0x1b   : > { %p997_p10 = pnand %p996_p9, %p995_p8 }
  0x1c   : > { %p1004_p1 = por %p1003_p11, %p1002_p12 }
  0x1d   : > { %p998_p0 = pneg %p997_p10 }
  0x1f   : > { %p1005_p4 = pnand %p1004_p1, %p998_p0 }
  0x21   : > { %1008 = shalt.err (!%p1005_p4)
}
  0x22   : > { %s1107_s4 = smov [#allocation6]   ;;  %s924_s5 = sshll.u32 %s1105_s12, 8 }
  0x23   : > { %939 = dma.vmem_to_smem (!%p1207_p7), %s111_s26, 16, %s1107_s4, [#allocation5]  }
  0x24   : > { %s125_s6 = scalar_lea.vmem [#allocation2], %s926_s30  ;;  %s1226_s16 = scalar_lea.hbm %s2115_s0, %s924_s5 }
  0x25   : > { %s132_s7 = sshll.u32 %s125_s6, 4  ;;  %s1230_s17 = scalar_lea.sflag [#allocation3], %s121_s28  ;;  %s1228_s7 = int_to_ptr.vmem [resolvable:$true] %s132_s7 }
  0x26   : > { %s1009_s19 = scalar_lea.hbm %s1226_s16, 1536  ;;  %p1011_p5 = pneg %p1214_p3 }
  0x27   : > { %p1010_p4 = scmp.ne.s32.totalorder %s1226_s16, %s1009_s19  ;;  %s1014_s26 = scalar_lea.hbm %s2115_s0, 3072 }
  0x28   : > { %p1015_p0 = scmp.lt.s32.totalorder %s1226_s16, %s2115_s0  ;;  %p1016_p2 = scmp.lt.s32.totalorder %s1014_s26, %s1009_s19 }
  0x29   : > { %p1012_p11 = pnand %p1011_p5, %p1010_p4 }
  0x2a   : > { %p1017_p7 = por %p1016_p2, %p1015_p0 }
  0x2b   : > { %p1013_p12 = pneg %p1012_p11 }
  0x2d   : > { %p1018_p8 = pnand %p1017_p7, %p1013_p12 }
  0x2f   : > { %1021 = shalt.err (!%p1018_p8)
}
  0x30   : > { %s1022_s28 = scalar_lea.vmem %s1228_s7, 1536  ;;  %s1108_s3 = smov [#allocation2]  }
  0x31   : > { %p1023_p9 = scmp.ne.s32.totalorder %s1228_s7, %s1022_s28  ;;  %s1027_s4 = sshll.u32 %s1108_s3, 4  ;;  %s1028_s4 = int_to_ptr.vmem [resolvable:$false] %s1027_s4 }
  0x32   : > { %s1029_s5 = scalar_lea.vmem %s1028_s4, 3072  ;;  %p1030_p4 = scmp.lt.s32.totalorder %s1228_s7, %s1028_s4 }
  0x33   : > { %p1025_p10 = pnand %p1023_p9, %p1011_p5  ;;  %p1031_p11 = scmp.lt.s32.totalorder %s1029_s5, %s1022_s28 }
  0x35   : > { %p1026_p1 = pneg %p1025_p10  ;;  %p1032_p6 = por %p1031_p11, %p1030_p4 }
  0x37   : > { %p1033_p13 = pnand %p1032_p6, %p1026_p1 }
  0x39   : > { %1036 = shalt.err (!%p1033_p13)
}
  0x3a   : > { %s1109_s6 = smov 512   ;;  %s1110_s8 = smov 256  }
  0x3b   : > { %s1111_s14 = smov 16   ;;  %p2156_p5 = scmp.ne.s32.totalorder %s2153_s23, 0 }
  0x3c   : > { %943 = dma.hbm_to_vmem [thread:$0]  (!%p1214_p3), %s1226_s16, 1536, %s1228_s7, %s1230_s17, %s1109_s6, %s1110_s8, %s1111_s14  }
  0x3d   : > { %144 = sbr.rel (%p2156_p5) target bundleno = 302 (0x12e), region = 28 }
  0x42   : > { %s1254_s19 = sand.u32 1, %s1097_s10   ;;  %p2157_p6 = scmp.ne.s32.totalorder %s2150_s20, 0 }
  0x43   : > { %s927_s24 = smul.u32 96, %s1254_s19  ;;  %s147_s25 = scalar_lea.sflag [#allocation3], %s1254_s19 }
  0x45   : > { %s150_s26 = scalar_lea.vmem [#allocation2], %s927_s24 }
  0x46   : > { %1080 = dma.done.wait (%p2157_p6), %s147_s25, 1536  }
  0x47   : > { %1082 = vsyncadd (%p2157_p6), %s147_s25, 4294965760  ;;  %p2158_p13 = scmp.eq.s32.totalorder %s1155_s13, 0 }
  0x49   : > { %1084 = dma.done.wait (%p2158_p13), [#allocation5], 16   ;;  %p2159_p3 = pmov %p2158_p13 }
  0x4b   : > { %1086 = vsyncadd (%p2159_p3), [#allocation5], 4294967280 }
  0x4c   : > { %159 = sfence }
  0x4d   : > { %v1268_v0 = vld [vmem:[%s150_s26 + $0x20] sm:$0xff]  ;;  %s1112_s23 = smov 1   ;;  %v1274_v2 = vld [vmem:[%s150_s26 + $0x30] sm:$0xff]  ;;  %v181_v6 = vld [vmem:[%s150_s26 + $0x18] sm:$0xff]  ;;  %s1113_s20 = smov 127   ;;  %v200_v12 = vlaneseq }
  0x4e   : > { %v1270_v1 = vld [vmem:[%s150_s26] sm:$0xff]  ;;  %233 = vrot.lane.b32.xlu1 %v1268_v0, %s1112_s23  ;;  %v1276_v3 = vld [vmem:[%s150_s26 + $0x10] sm:$0xff]  ;;  %v179_v7 = vld [vmem:[%s150_s26 + $0x8] sm:$0xff]  ;;  %s911_s29 = sld [smem:[#allocation6 + $0x1]]  ;;  %s1957_s6 = scalar_lea.vmem [#allocation7], %s927_s24 }
  0x4f   : > { %229 = vrot.lane.b32.xlu0 %v1270_v1, %s1112_s23  ;;  %v1280_v4 = vld [vmem:[%s150_s26 + $0x50] sm:$0xff]  ;;  %v1282_v5 = vld [vmem:[%s150_s26 + $0x40] sm:$0xff]  ;;  %v185_v8 = vld [vmem:[%s150_s26 + $0x38] sm:$0xff]  ;;  %s190_s7 = sld [smem:[#allocation6]]  ;;  %v1304_v13 = vand.u32 127, %v200_v12  ;;  %v1312_v19 = vshrl.u32 %v200_v12, 7 }
  0x50   : > { %v1286_v9 = vld [vmem:[%s150_s26 + $0x28] sm:$0xff]  ;;  %v1289_v10 = vld [vmem:[%s150_s26 + $0x58] sm:$0xff]  ;;  %s914_s16 = sld [smem:[#allocation6 + $0x4]]  ;;  %s925_s8 = sshll.u32 %s1155_s13, 8 }
  0x51   : > { %v1291_v11 = vld [vmem:[%s150_s26 + $0x48] sm:$0xff]  ;;  %s913_s17 = sld [smem:[#allocation6 + $0x3]]  ;;  %v1307_v14 = vadd.s32 128, %v1304_v13  ;;  %v570_v35 = vadd.s32 8, %v1312_v19  ;;  %v571_v44 = vadd.s32 16, %v1312_v19  ;;  %v1374_v45 = vadd.s32 24, %v1312_v19  ;;  %s2060_s25 = scalar_lea.hbm %s2117_s2, %s925_s8 }
  0x52   : > { %235 = vrot.lane.b32.xlu1 %v1274_v2, %s1112_s23  ;;  %s917_s27 = sld [smem:[#allocation6 + $0x7]]  ;;  %vm253_vm0 = vcmp.lt.s32.totalorder %v1304_v13, 1  ;;  %vm227_vm1 = vcmp.gt.s32.totalorder %v1304_v13, 0  ;;  %v573_v54 = vadd.s32 32, %v1312_v19  ;;  %vm695_vm13 = vcmp.eq.s32.totalorder %v1312_v19, 0  ;;  %s818_s14 = sshll.u32 %s1957_s6, 4  ;;  %s2064_s14 = int_to_ptr.vmem [resolvable:$true] %s818_s14 }
  0x53   : > { %231 = vrot.lane.b32.xlu0 %v1276_v3, %s1112_s23  ;;  %s916_s30 = sld [smem:[#allocation6 + $0x6]]  ;;  %v2122_v16 = vand.u32 127, %v1307_v14  ;;  %v586_v53 = vand.u32 7, %v570_v35  ;;  %v593_v61 = vand.u32 7, %v571_v44  ;;  %v600_v62 = vand.u32 7, %v1374_v45  ;;  %s805_s26 = scalar_lea.sflag [#allocation4], %s1254_s19 }
  0x54   : > { %v342_v15 = vstv %s911_s29  ;;  %s1363_s28 = sld [smem:[#allocation6 + $0x2]]  ;;  %vm672_vm4 = vcmp.ge.s32.totalorder %v570_v35, 15  ;;  %vm657_vm12 = vcmp.le.s32.totalorder %v573_v54, 32  ;;  %p2227_p0 = scmp.ne.s32.totalorder %s2151_s21, 0 }
  0x55   : > { %v1310_v17 = vstv %s190_s7  ;;  %v1317_v21 = vmul.f32 %v342_v15, %v1276_v3  ;;  %v1319_v22 = vmul.f32 %v342_v15, %v181_v6  ;;  %v1321_v23 = vmul.f32 %v342_v15, %v179_v7  ;;  %s1370_s3 = sld [smem:[#allocation6 + $0x5]] }
  0x56   : > { %239 = vrot.lane.b32.xlu1 %v1280_v4, %s1112_s23  ;;  %v405_v18 = vstv %s914_s16  ;;  %v1324_v25 = vmul.f32 %v342_v15, %v1270_v1  ;;  %v1327_v26 = vmul.f32 %v342_v15, %v1274_v2  ;;  %v1329_v27 = vmul.f32 %v342_v15, %v185_v8  ;;  %s1389_s4 = sld [smem:[#allocation6 + $0x8]] }
  0x57   : > { %237 = vrot.lane.b32.xlu0 %v1282_v5, %s1112_s23  ;;  %v1314_v20 = vstv %s913_s17  ;;  %v1334_v29 = vmul.f32 %v405_v18, %v1276_v3  ;;  %v1336_v30 = vmul.f32 %v405_v18, %v181_v6  ;;  %v1338_v31 = vmul.f32 %v405_v18, %v179_v7  ;;  %s1462_s5 = sld [smem:[#allocation6 + $0x9]] }
  0x58   : > { %v468_v24 = vstv %s917_s27  ;;  %v1341_v32 = vmul.f32 %v405_v18, %v1270_v1  ;;  %v1344_v33 = vmul.f32 %v405_v18, %v1274_v2  ;;  %v1346_v34 = vmul.f32 %v405_v18, %v185_v8 }
  0x59   : > { %v1331_v28 = vstv %s916_s30  ;;  %v1354_v38 = vmul.f32 %v468_v24, %v1276_v3  ;;  %v1356_v39 = vmul.f32 %v468_v24, %v181_v6  ;;  %v1358_v40 = vmul.f32 %v468_v24, %v179_v7 }
  0x5a   : > { %243 = vrot.lane.b32.xlu1 %v181_v6, %s1112_s23  ;;  %v1361_v41 = vmul.f32 %v468_v24, %v1270_v1  ;;  %v1366_v42 = vmul.f32 %v468_v24, %v1274_v2  ;;  %v1368_v43 = vmul.f32 %v468_v24, %v185_v8  ;;  %v1378_v46 = vmul.f32 %v342_v15, %v1268_v0 }
  0x5b   : > { %241 = vrot.lane.b32.xlu0 %v179_v7, %s1112_s23  ;;  %v1381_v47 = vmul.f32 %v342_v15, %v1286_v9  ;;  %v1384_v48 = vmul.f32 %v405_v18, %v1268_v0  ;;  %v1387_v49 = vmul.f32 %v405_v18, %v1286_v9  ;;  %vm1394_vm2 = vcmp.gt.s32.totalorder %v2122_v16, 0 }
  0x5c   : > { %v1399_v51 = vmul.f32 %v468_v24, %v1268_v0  ;;  %v1402_v52 = vmul.f32 %v468_v24, %v1286_v9  ;;  %v1408_v57 = vmul.f32 %v342_v15, %v1280_v4  ;;  %v1411_v58 = vmul.f32 %v342_v15, %v1289_v10 }
  0x5d   : > { %v1414_v59 = vmul.f32 %v405_v18, %v1280_v4  ;;  %v1417_v60 = vmul.f32 %v405_v18, %v1289_v10  ;;  %vm1420_vm3 = vcmp.eq.s32.totalorder %v586_v53, 7  ;;  %vm1436_vm5 = vcmp.eq.s32.totalorder %v586_v53, 0 }
  0x5e   : > { %247 = vrot.lane.b32.xlu1 %v185_v8, %s1112_s23  ;;  %v1449_v12 = vmul.f32 %v405_v18, %v1291_v11  ;;  %v1455_v35 = vmul.f32 %v468_v24, %v1291_v11  ;;  %vm678_vm6 = vmand %vm1420_vm3, %vm672_vm4  ;;  %v1460_v44 = vstv %s1363_s28  ;;  %vm649_vm7 = vcmp.eq.s32.totalorder %v593_v61, 0 }
  0x5f   : > { %245 = vrot.lane.b32.xlu0 %v1286_v9, %s1112_s23  ;;  %2170 = vst [vmem:[#allocation15_spill] sm:$0xff] %v1460_v44  ;;  %vm650_vm8 = vcmp.eq.s32.totalorder %v600_v62, 0  ;;  %vm667_vm9 = vcmp.eq.s32.totalorder %v593_v61, 7  ;;  %v1465_v45 = vstv %s1370_s3  ;;  %v1114_v53 = vmov 1.0  }
  0x60   : > { %2167 = vst [vmem:[#allocation12_spill] sm:$0xff] %v1449_v12  ;;  %2169 = vst [vmem:[#allocation14_spill] sm:$0xff] %v1455_v35  ;;  %v1481_v35 = vsel %vm649_vm7, 0.5, %v1114_v53  ;;  %v1485_v12 = vsel %vm667_vm9, 0.5, %v1114_v53  ;;  %vm668_vm3 = vcmp.eq.s32.totalorder %v600_v62, 7  ;;  %v1514_v63 = vstv %s1462_s5 }
  0x61   : > { %2171 = vst [vmem:[#allocation16_spill] sm:$0xff] %v1465_v45  ;;  %2177 = vst [vmem:[#allocation20_spill] sm:$0xff] %v1481_v35 }
  0x62   : > { %251 = vrot.lane.b32.xlu1 %v1289_v10, %s1112_s23  ;;  %2179 = vst [vmem:[#allocation22_spill] sm:$0xff] %v1485_v12  ;;  %2180 = vst [vmem:[#allocation23_spill] sm:$0xff] %v1514_v63 }
  0x63   : > { %249 = vrot.lane.b32.xlu0 %v1291_v11, %s1112_s23  ;;  %s1037_s23 = scalar_lea.vmem %s2064_s14, 1536 }
  0x64   : > { %p1038_p12 = scmp.ne.s32.totalorder %s2064_s14, %s1037_s23 }
  0x66   : > { %282 = vrot.lane.b32.xlu1 %v1276_v3, %s1113_s20  ;;  %v1434_v3 = vmul.f32 %v342_v15, %v1291_v11  ;;  %p1039_p2 = pnand %p1038_p12, %p2227_p0 }
  0x67   : > { %280 = vrot.lane.b32.xlu0 %v1270_v1, %s1113_s20  ;;  %v1428_v1 = vmul.f32 %v468_v24, %v1289_v10 }
  0x68   : > { %p1040_p7 = pneg %p1039_p2 }
  0x6a   : > { %286 = vrot.lane.b32.xlu1 %v1274_v2, %s1113_s20  ;;  %v1431_v2 = vmul.f32 %v342_v15, %v1282_v5  ;;  %v1452_v15 = vmul.f32 %v468_v24, %v1282_v5 }
  0x6b   : > { %284 = vrot.lane.b32.xlu0 %v1268_v0, %s1113_s20  ;;  %v1425_v0 = vmul.f32 %v468_v24, %v1280_v4  ;;  %v1475_v24 = vsel %vm678_vm6, 0.5, %v1114_v53 }
  0x6c   : > { %2168 = vst [vmem:[#allocation13_spill] sm:$0xff] %v1452_v15  ;;  %2174 = vst [vmem:[#allocation19_spill] sm:$0xff] %v1475_v24  ;;  %v1483_v15 = vsel %vm650_vm8, 0.5, %v1114_v53 }
  0x6d   : > { %2178 = vst [vmem:[#allocation21_spill] sm:$0xff] %v1483_v15 }
  0x6e   : > { %290 = vrot.lane.b32.xlu1 %v1280_v4, %s1113_s20 }
  0x6f   : > { %288 = vrot.lane.b32.xlu0 %v1282_v5, %s1113_s20 }
  0x72   : > { %294 = vrot.lane.b32.xlu1 %v181_v6, %s1113_s20 }
  0x73   : > { %292 = vrot.lane.b32.xlu0 %v179_v7, %s1113_s20  ;;  %v579_v7 = vand.u32 7, %v1312_v19 }
  0x75   : > { %vm647_vm10 = vcmp.eq.s32.totalorder %v579_v7, 0 }
  0x76   : > { %298 = vrot.lane.b32.xlu1 %v185_v8, %s1113_s20  ;;  %v607_v8 = vand.u32 7, %v573_v54  ;;  %v701_v35 = vsel %vm647_vm10, 0.5, %v1114_v53 }
  0x77   : > { %296 = vrot.lane.b32.xlu0 %v1286_v9, %s1113_s20 }
  0x78   : > { %vm1477_vm11 = vcmp.eq.s32.totalorder %v607_v8, 0  ;;  %vm669_vm4 = vcmp.eq.s32.totalorder %v607_v8, 7 }
  0x79   : > { %vm663_vm15 = vmand %vm1477_vm11, %vm657_vm12  ;;  %v1528_v44 = vsel %vm669_vm4, 0.5, %v1114_v53 }
  0x7a   : > { %302 = vrot.lane.b32.xlu1 %v1289_v10, %s1113_s20  ;;  %v1446_v10 = vmul.f32 %v405_v18, %v1282_v5  ;;  %v1468_v18 = vstv %s1389_s4  ;;  %v1472_v5 = vsel %vm1436_vm5, 0.5, %v1114_v53  ;;  %v1522_v8 = vsel %vm663_vm15, 0.5, %v1114_v53  ;;  %2185 = vst [vmem:[#allocation28_spill] sm:$0xff] %v1528_v44 }
  0x7b   : > { %300 = vrot.lane.b32.xlu0 %v1291_v11, %s1113_s20  ;;  %2172 = vst [vmem:[#allocation17_spill] sm:$0xff] %v1468_v18  ;;  %2173 = vst [vmem:[#allocation18_spill] sm:$0xff] %v1472_v5  ;;  %v574_v11 = vadd.s32 40, %v1312_v19  ;;  %v1518_v5 = vsel %vm695_vm13, 0.0, %v701_v35  ;;  %vm278_vm5 = vcmp.lt.s32.totalorder %v1304_v13, 127  ;;  %s1115_s20 = smov [#allocation7]  }
  0x7c   : > { %2166 = vst [vmem:[#allocation11_spill] sm:$0xff] %v1446_v10  ;;  %2181 = vst [vmem:[#allocation24_spill] sm:$0xff] %v1518_v5  ;;  %s1041_s29 = sshll.u32 %s1115_s20, 4  ;;  %s1042_s29 = int_to_ptr.vmem [resolvable:$false] %s1041_s29 }
  0x7d   : > { %vm718_vm14 = vcmp.eq.s32.totalorder %v574_v11, 47  ;;  %2183 = vst [vmem:[#allocation26_spill] sm:$0xff] %v1522_v8  ;;  %s1043_s7 = scalar_lea.vmem %s1042_s29, 3072  ;;  %p1044_p8 = scmp.lt.s32.totalorder %s2064_s14, %s1042_s29 }
  0x7e   : > { %v1520_v62 = vsel %vm718_vm14, 0.0, %v1114_v53  ;;  %p1045_p9 = scmp.lt.s32.totalorder %s1043_s7, %s1037_s23 }
  0x7f   : > { %2182 = vst [vmem:[#allocation25_spill] sm:$0xff] %v1520_v62 }
  0x80   : > { %p1046_p10 = por %p1045_p9, %p1044_p8 }
  0x82   : > { %p1047_p1 = pnand %p1046_p10, %p1040_p7 }
  0xc0   : > { %v1349_v36 = vpop.permute.xlu1 %233 }
  0xc1   : > { %v1351_v37 = vpop.permute.xlu0 %229 }
  0xc4   : > { %v1405_v55 = vpop.permute.xlu1 %235 }
  0xc5   : > { %v232_v56 = vpop.permute.xlu0 %231 }
  0xc8   : > { %v1441_v4 = vpop.permute.xlu1 %239 }
  0xc9   : > { %v1443_v9 = vpop.permute.xlu0 %237 }
  0xcc   : > { %v244_v61 = vpop.permute.xlu1 %243 }
  0xcd   : > { %v242_v16 = vpop.permute.xlu0 %241  ;;  %v255_v6 = vsel %vm253_vm0, %v232_v56, %v244_v61  ;;  %v261_v7 = vsel %vm253_vm0, %v244_v61, %v232_v56 }
  0xce   : > { %v254_v10 = vsel %vm253_vm0, %v1351_v37, %v242_v16  ;;  %v260_v24 = vsel %vm253_vm0, %v242_v16, %v1351_v37  ;;  %v268_v12 = vsel %vm227_vm1, %v261_v7, 0.0  ;;  %v269_v15 = vsel %vm1394_vm2, %v255_v6, 0.0 }
  0xcf   : > { %v332_v56 = vmul.f32 %v1310_v17, %v268_v12  ;;  %v333_v61 = vmul.f32 %v1310_v17, %v269_v15  ;;  %v395_v16 = vmul.f32 %v1314_v20, %v268_v12  ;;  %v396_v37 = vmul.f32 %v1314_v20, %v269_v15 }
  0xd0   : > { %v266_v7 = vsel %vm227_vm1, %v260_v24, 0.0  ;;  %v267_v11 = vsel %vm1394_vm2, %v254_v10, 0.0  ;;  %v248_v54 = vpop.permute.xlu1 %247  ;;  %v458_v18 = vmul.f32 %v1331_v28, %v268_v12  ;;  %v459_v45 = vmul.f32 %v1331_v28, %v269_v15 }
  0xd1   : > { %v246_v6 = vpop.permute.xlu0 %245  ;;  %v1526_v24 = vsel %vm668_vm3, 0.5, %v1114_v53  ;;  %v1531_v10 = vadd.f32 %v1317_v21, %v332_v56  ;;  %v1534_v63 = vadd.f32 %v1319_v22, %v333_v61  ;;  %v330_v35 = vmul.f32 %v1310_v17, %v266_v7 }
  0xd2   : > { %2184 = vst [vmem:[#allocation27_spill] sm:$0xff] %v1526_v24  ;;  %v331_v62 = vmul.f32 %v1310_v17, %v267_v11  ;;  %v1539_v8 = vadd.f32 %v1334_v29, %v395_v16  ;;  %v1542_v12 = vadd.f32 %v1336_v30, %v396_v37  ;;  %v257_v15 = vsel %vm253_vm0, %v1405_v55, %v248_v54 }
  0xd3   : > { %v263_v21 = vsel %vm253_vm0, %v248_v54, %v1405_v55  ;;  %v393_v56 = vmul.f32 %v1314_v20, %v266_v7  ;;  %v394_v61 = vmul.f32 %v1314_v20, %v267_v11  ;;  %v256_v29 = vsel %vm253_vm0, %v1349_v36, %v246_v6 }
  0xd4   : > { %v252_v22 = vpop.permute.xlu1 %251  ;;  %v262_v30 = vsel %vm253_vm0, %v246_v6, %v1349_v36  ;;  %v456_v16 = vmul.f32 %v1331_v28, %v266_v7  ;;  %v457_v37 = vmul.f32 %v1331_v28, %v267_v11  ;;  %v272_v55 = vsel %vm227_vm1, %v263_v21, 0.0 }
  0xd5   : > { %v250_v53 = vpop.permute.xlu0 %249  ;;  %v273_v54 = vsel %vm1394_vm2, %v257_v15, 0.0  ;;  %v1565_v44 = vadd.f32 %v1354_v38, %v458_v18  ;;  %v1568_v24 = vadd.f32 %v1356_v39, %v459_v45  ;;  %v336_v5 = vmul.f32 %v1310_v17, %v272_v55 }
  0xd6   : > { %v337_v36 = vmul.f32 %v1310_v17, %v273_v54  ;;  %v1573_v7 = vadd.f32 %v1324_v25, %v330_v35  ;;  %v1576_v11 = vadd.f32 %v1321_v23, %v331_v62  ;;  %v270_v6 = vsel %vm227_vm1, %v262_v30, 0.0 }
  0xd7   : > { %v271_v38 = vsel %vm1394_vm2, %v256_v29, 0.0  ;;  %v1587_v45 = vadd.f32 %v1341_v32, %v393_v56  ;;  %v1590_v15 = vadd.f32 %v1338_v31, %v394_v61  ;;  %v399_v25 = vmul.f32 %v1314_v20, %v272_v55 }
  0xd8   : > { %v1582_v18 = vpop.permute.xlu1 %282  ;;  %v400_v23 = vmul.f32 %v1314_v20, %v273_v54  ;;  %v1595_v62 = vadd.f32 %v1361_v41, %v456_v16  ;;  %v1598_v35 = vadd.f32 %v1358_v40, %v457_v37  ;;  %v462_v21 = vmul.f32 %v1331_v28, %v272_v55 }
  0xd9   : > { %v1584_v39 = vpop.permute.xlu0 %280  ;;  %2186 = vst [vmem:[#allocation29_spill] sm:$0xff] %v1587_v45  ;;  %2187 = vst [vmem:[#allocation30_spill] sm:$0xff] %v1590_v15  ;;  %v463_v29 = vmul.f32 %v1331_v28, %v273_v54  ;;  %v1604_v32 = vadd.f32 %v1327_v26, %v336_v5  ;;  %v1607_v31 = vadd.f32 %v1329_v27, %v337_v36  ;;  %v2189_v16 = vand.u32 127, %v1307_v14 }
  0xda   : > { %v334_v56 = vmul.f32 %v1310_v17, %v270_v6  ;;  %v335_v41 = vmul.f32 %v1310_v17, %v271_v38  ;;  %v259_v40 = vsel %vm253_vm0, %v1441_v4, %v252_v22  ;;  %v265_v61 = vsel %vm253_vm0, %v252_v22, %v1441_v4 }
  0xdb   : > { %v258_v26 = vsel %vm253_vm0, %v1443_v9, %v250_v53  ;;  %v264_v27 = vsel %vm253_vm0, %v250_v53, %v1443_v9  ;;  %vm1629_vm6 = vcmp.lt.s32.totalorder %v2189_v16, 127  ;;  %v1634_v4 = vadd.f32 %v1344_v33, %v399_v25 }
  0xdc   : > { %v1623_v5 = vpop.permute.xlu1 %286  ;;  %v1637_v22 = vadd.f32 %v1346_v34, %v400_v23  ;;  %v397_v55 = vmul.f32 %v1314_v20, %v270_v6  ;;  %v398_v9 = vmul.f32 %v1314_v20, %v271_v38  ;;  %v276_v53 = vsel %vm227_vm1, %v265_v61, 0.0 }
  0xdd   : > { %v1625_v30 = vpop.permute.xlu0 %284  ;;  %v277_v14 = vsel %vm1394_vm2, %v259_v40, 0.0  ;;  %v274_v54 = vsel %vm227_vm1, %v264_v27, 0.0  ;;  %v275_v33 = vsel %vm1394_vm2, %v258_v26, 0.0  ;;  %v460_v36 = vmul.f32 %v1331_v28, %v270_v6 }
  0xde   : > { %2188 = vst [vmem:[#allocation31_spill] sm:$0xff] %v1625_v30  ;;  %v461_v34 = vmul.f32 %v1331_v28, %v271_v38  ;;  %v340_v25 = vmul.f32 %v1310_v17, %v276_v53  ;;  %v341_v23 = vmul.f32 %v1310_v17, %v277_v14  ;;  %v403_v16 = vmul.f32 %v1314_v20, %v276_v53 }
  0xdf   : > { %v404_v61 = vmul.f32 %v1314_v20, %v277_v14  ;;  %v466_v40 = vmul.f32 %v1331_v28, %v276_v53  ;;  %v467_v15 = vmul.f32 %v1331_v28, %v277_v14  ;;  %v1662_v6 = vadd.f32 %v1366_v42, %v462_v21 }
  0xe0   : > { %v1657_v27 = vpop.permute.xlu1 %290  ;;  %v1665_v38 = vadd.f32 %v1368_v43, %v463_v29  ;;  %v338_v26 = vmul.f32 %v1310_v17, %v274_v54  ;;  %v339_v45 = vmul.f32 %v1310_v17, %v275_v33  ;;  %v1670_v30 = vadd.f32 %v1378_v46, %v334_v56  ;;  %v2193_v29 = vld [vmem:[#allocation15_spill] sm:$0xff] }
  0xe1   : > { %v1659_v50 = vpop.permute.xlu0 %288  ;;  %v1673_v53 = vadd.f32 %v1381_v47, %v335_v41  ;;  %v1676_v14 = vadd.f32 %v1384_v48, %v397_v55  ;;  %v1682_v42 = vadd.f32 %v1399_v51, %v460_v36  ;;  %v1685_v43 = vadd.f32 %v1402_v52, %v461_v34  ;;  %v2194_v55 = vld [vmem:[#allocation16_spill] sm:$0xff]  ;;  %v2195_v36 = vld [vmem:[#allocation17_spill] sm:$0xff] }
  0xe2   : > { %2192 = vst [vmem:[#allocation32_spill] sm:$0xff] %v1659_v50  ;;  %v1679_v50 = vadd.f32 %v1387_v49, %v398_v9  ;;  %v1688_v17 = vadd.f32 %v1408_v57, %v340_v25  ;;  %v1691_v46 = vadd.f32 %v1411_v58, %v341_v23  ;;  %v1694_v47 = vadd.f32 %v1414_v59, %v403_v16 }
  0xe3   : > { %v1697_v48 = vadd.f32 %v1417_v60, %v404_v61  ;;  %v1700_v49 = vadd.f32 %v1425_v0, %v466_v40  ;;  %v1703_v51 = vadd.f32 %v1428_v1, %v467_v15  ;;  %v1706_v57 = vadd.f32 %v1431_v2, %v338_v26 }
  0xe4   : > { %v295_v52 = vpop.permute.xlu1 %294  ;;  %v1709_v58 = vadd.f32 %v1434_v3, %v339_v45  ;;  %v1712_v59 = vmul.f32 %v1314_v20, %v274_v54  ;;  %v1715_v60 = vmul.f32 %v1314_v20, %v275_v33  ;;  %vm532_vm0 = vcmp.lt.s32.totalorder %v1312_v19, 1 }
  0xe5   : > { %v293_v21 = vpop.permute.xlu0 %292  ;;  %v306_v0 = vsel %vm278_vm5, %v1582_v18, %v295_v52  ;;  %v312_v1 = vsel %vm278_vm5, %v295_v52, %v1582_v18  ;;  %vm557_vm1 = vcmp.lt.s32.totalorder %v1312_v19, 7  ;;  %v1748_v61 = vmul.f32 %v1331_v28, %v274_v54 }
  0xe6   : > { %v305_v2 = vsel %vm278_vm5, %v1584_v39, %v293_v21  ;;  %v311_v3 = vsel %vm278_vm5, %v293_v21, %v1584_v39  ;;  %v319_v20 = vsel %vm278_vm5, %v306_v0, 0.0  ;;  %v320_v45 = vsel %vm1629_vm6, %v312_v1, 0.0 }
  0xe7   : > { %v317_v15 = vsel %vm278_vm5, %v305_v2, 0.0  ;;  %v318_v18 = vsel %vm1629_vm6, %v311_v3, 0.0  ;;  %v370_v56 = vmul.f32 %v2193_v29, %v319_v20  ;;  %v371_v41 = vmul.f32 %v2193_v29, %v320_v45 }
  0xe8   : > { %v433_v9 = vmul.f32 %v2194_v55, %v319_v20  ;;  %v434_v39 = vmul.f32 %v2194_v55, %v320_v45  ;;  %v496_v34 = vmul.f32 %v2195_v36, %v319_v20  ;;  %v497_v25 = vmul.f32 %v2195_v36, %v320_v45  ;;  %v299_v2 = vpop.permute.xlu1 %298 }
  0xe9   : > { %v368_v23 = vmul.f32 %v2193_v29, %v317_v15  ;;  %v369_v16 = vmul.f32 %v2193_v29, %v318_v18  ;;  %v1751_v40 = vmul.f32 %v1331_v28, %v275_v33  ;;  %v1754_v26 = vadd.f32 %v370_v56, %v1531_v10 }
  0xea   : > { %v1757_v52 = vadd.f32 %v371_v41, %v1534_v63  ;;  %v1760_v21 = vadd.f32 %v496_v34, %v1565_v44  ;;  %v1763_v0 = vadd.f32 %v497_v25, %v1568_v24  ;;  %v445_v28 = vadd.f32 %v433_v9, %v1539_v8  ;;  %v2196_v34 = vld [vmem:[#allocation18_spill] sm:$0xff] }
  0xeb   : > { %v1766_v1 = vadd.f32 %v368_v23, %v1573_v7  ;;  %v1769_v54 = vadd.f32 %v369_v16, %v1576_v11  ;;  %v446_v10 = vadd.f32 %v434_v39, %v1542_v12  ;;  %v2144_v33 = vrot.slane %v1754_v26, 7 }
  0xec   : > { %v2141_v63 = vrot.slane %v1757_v52, 7  ;;  %v1776_v44 = vmul.f32 %v2194_v55, %v317_v15  ;;  %v1779_v24 = vmul.f32 %v2194_v55, %v318_v18  ;;  %v494_v7 = vmul.f32 %v2195_v36, %v317_v15 }
  0xed   : > { %v495_v11 = vmul.f32 %v2195_v36, %v318_v18  ;;  %v2143_v3 = vrot.slane %v1760_v21, 1  ;;  %v2146_v8 = vrot.slane %v1763_v0, 1  ;;  %v2140_v12 = vrot.slane %v1766_v1, 7 }
  0xee   : > { %v2139_v20 = vrot.slane %v1769_v54, 7  ;;  %v1788_v45 = vadd.f32 %v494_v7, %v1595_v62  ;;  %v308_v15 = vsel %vm278_vm5, %v1623_v5, %v299_v2  ;;  %v314_v18 = vsel %vm278_vm5, %v299_v2, %v1623_v5 }
  0xef   : > { %v1791_v56 = vadd.f32 %v495_v11, %v1598_v35  ;;  %v541_v41 = vsel %vm532_vm0, %v2140_v12, %v2144_v33  ;;  %v323_v35 = vsel %vm278_vm5, %v308_v15, 0.0  ;;  %v324_v5 = vsel %vm1629_vm6, %v314_v18, 0.0  ;;  %v297_v15 = vpop.permute.xlu0 %296 }
  0xf0   : > { %v542_v62 = vsel %vm532_vm0, %v2139_v20, %v2141_v63  ;;  %v2142_v9 = vrot.slane %v1788_v45, 1  ;;  %v733_v25 = vmul.f32 %v2196_v34, %v541_v41  ;;  %v374_v16 = vmul.f32 %v2193_v29, %v323_v35 }
  0xf1   : > { %v2145_v39 = vrot.slane %v1791_v56, 1  ;;  %v734_v23 = vmul.f32 %v2196_v34, %v542_v62  ;;  %v375_v2 = vmul.f32 %v2193_v29, %v324_v5  ;;  %v437_v7 = vmul.f32 %v2194_v55, %v323_v35 }
  0xf2   : > { %v438_v11 = vmul.f32 %v2194_v55, %v324_v5  ;;  %v1829_v18 = vsel %vm557_vm1, %v2142_v9, %v2143_v3  ;;  %v745_v62 = vadd.f32 %v733_v25, %v445_v28  ;;  %v1840_v20 = vadd.f32 %v374_v16, %v1604_v32 }
  0xf3   : > { %2197 = vst [vmem:[#allocation15_spill] sm:$0xff] %v1829_v18  ;;  %v1837_v41 = vsel %vm557_vm1, %v2145_v39, %v2146_v8  ;;  %v746_v34 = vadd.f32 %v734_v23, %v446_v10  ;;  %v1843_v12 = vadd.f32 %v375_v2, %v1607_v31  ;;  %v449_v63 = vadd.f32 %v437_v7, %v1634_v4  ;;  %v2198_v18 = vld [vmem:[#allocation31_spill] sm:$0xff]  ;;  %v303_v7 = vpop.permute.xlu1 %302 }
  0xf4   : > { %v450_v9 = vadd.f32 %v438_v11, %v1637_v22  ;;  %v500_v3 = vmul.f32 %v2195_v36, %v323_v35  ;;  %v501_v33 = vmul.f32 %v2195_v36, %v324_v5  ;;  %v307_v39 = vsel %vm278_vm5, %v2198_v18, %v297_v15 }
  0xf5   : > { %v313_v32 = vsel %vm278_vm5, %v297_v15, %v2198_v18  ;;  %v524_v28 = vrot.slane %v1840_v20, 7  ;;  %v525_v31 = vrot.slane %v1843_v12, 7  ;;  %v321_v4 = vsel %vm278_vm5, %v307_v39, 0.0 }
  0xf6   : > { %v322_v22 = vsel %vm1629_vm6, %v313_v32, 0.0  ;;  %v1862_v10 = vadd.f32 %v500_v3, %v1662_v6  ;;  %v1865_v35 = vadd.f32 %v501_v33, %v1665_v38  ;;  %v372_v5 = vmul.f32 %v2193_v29, %v321_v4 }
  0xf7   : > { %v373_v25 = vmul.f32 %v2193_v29, %v322_v22  ;;  %v435_v23 = vmul.f32 %v2194_v55, %v321_v4  ;;  %v436_v16 = vmul.f32 %v2194_v55, %v322_v22  ;;  %v498_v2 = vmul.f32 %v2195_v36, %v321_v4 }
  0xf8   : > { %v499_v39 = vmul.f32 %v2195_v36, %v322_v22  ;;  %v2148_v11 = vrot.slane %v1862_v10, 1  ;;  %v2147_v6 = vrot.slane %v1865_v35, 1  ;;  %v384_v38 = vadd.f32 %v372_v5, %v1670_v30 }
  0xf9   : > { %v385_v33 = vadd.f32 %v373_v25, %v1673_v53  ;;  %v447_v3 = vadd.f32 %v435_v23, %v1676_v14  ;;  %v448_v15 = vadd.f32 %v436_v16, %v1679_v50  ;;  %v510_v18 = vadd.f32 %v498_v2, %v1682_v42 }
  0xfa   : > { %v511_v32 = vadd.f32 %v499_v39, %v1685_v43  ;;  %v522_v4 = vrot.slane %v384_v38, 7  ;;  %v310_v22 = vsel %vm278_vm5, %v1657_v27, %v303_v7  ;;  %v316_v30 = vsel %vm278_vm5, %v303_v7, %v1657_v27  ;;  %v2203_v38 = vld [vmem:[#allocation20_spill] sm:$0xff] }
  0xfb   : > { %v523_v8 = vrot.slane %v385_v33, 7  ;;  %v549_v5 = vrot.slane %v510_v18, 1  ;;  %v327_v14 = vsel %vm278_vm5, %v310_v22, 0.0  ;;  %v328_v50 = vsel %vm1629_vm6, %v316_v30, 0.0  ;;  %v2205_v30 = vld [vmem:[#allocation19_spill] sm:$0xff] }
  0xfc   : > { %v550_v53 = vrot.slane %v511_v32, 1  ;;  %v537_v42 = vsel %vm532_vm0, %v522_v4, %v524_v28  ;;  %v2199_v27 = vrot.slane %v1754_v26, 7  ;;  %v2200_v23 = vrot.slane %v1757_v52, 7  ;;  %v2204_v32 = vld [vmem:[#allocation21_spill] sm:$0xff] }
  0xfd   : > { %v538_v43 = vsel %vm532_vm0, %v523_v8, %v525_v31  ;;  %v562_v2 = vsel %vm557_vm1, %v549_v5, %v2148_v11  ;;  %v2201_v26 = vrot.slane %v1760_v21, 1  ;;  %v2202_v52 = vrot.slane %v1763_v0, 1 }
  0xfe   : > { %v539_v25 = vsel %vm532_vm0, %v2199_v27, %v522_v4  ;;  %v540_v16 = vsel %vm532_vm0, %v2200_v23, %v523_v8  ;;  %v563_v39 = vsel %vm557_vm1, %v550_v53, %v2147_v6  ;;  %v737_v4 = vmul.f32 %v2204_v32, %v537_v42  ;;  %v2206_v23 = vld [vmem:[#allocation22_spill] sm:$0xff] }
  0xff   : > { %v564_v7 = vsel %vm557_vm1, %v2201_v26, %v549_v5  ;;  %v565_v8 = vsel %vm557_vm1, %v2202_v52, %v550_v53  ;;  %v735_v33 = vmul.f32 %v2203_v38, %v539_v25  ;;  %v736_v18 = vmul.f32 %v2203_v38, %v540_v16  ;;  %v301_v38 = vpop.permute.xlu0 %300 }
 0x100   : > { %v738_v22 = vmul.f32 %v2204_v32, %v538_v43  ;;  %v757_v27 = vmul.f32 %v2205_v30, %v564_v7  ;;  %v758_v21 = vmul.f32 %v2205_v30, %v565_v8  ;;  %v759_v6 = vmul.f32 %v2206_v23, %v562_v2  ;;  %v2207_v7 = vld [vmem:[#allocation11_spill] sm:$0xff]  ;;  %v2208_v2 = vld [vmem:[#allocation12_spill] sm:$0xff] }
 0x101   : > { %v760_v5 = vmul.f32 %v2206_v23, %v563_v39  ;;  %v747_v0 = vadd.f32 %v735_v33, %v447_v3  ;;  %v748_v26 = vadd.f32 %v736_v18, %v448_v15  ;;  %v1931_v11 = vadd.f32 %v737_v4, %v449_v63  ;;  %v2209_v15 = vld [vmem:[#allocation23_spill] sm:$0xff]  ;;  %v2210_v33 = vld [vmem:[#allocation29_spill] sm:$0xff]  ;;  %v2212_v30 = vld [vmem:[#allocation32_spill] sm:$0xff] }
 0x102   : > { %v1933_v53 = vadd.f32 %v738_v22, %v450_v9  ;;  %v769_v25 = vadd.f32 %v757_v27, %v745_v62  ;;  %v770_v16 = vadd.f32 %v758_v21, %v746_v34  ;;  %v378_v42 = vmul.f32 %v2193_v29, %v327_v14 }
 0x103   : > { %v379_v43 = vmul.f32 %v2193_v29, %v328_v50  ;;  %v1939_v52 = vadd.f32 %v2207_v7, %v1712_v59  ;;  %v1943_v39 = vadd.f32 %v2208_v2, %v1715_v60  ;;  %v771_v3 = vadd.f32 %v759_v6, %v747_v0  ;;  %v2211_v59 = vld [vmem:[#allocation30_spill] sm:$0xff] }
 0x104   : > { %v772_v63 = vadd.f32 %v760_v5, %v748_v26  ;;  %v782_v9 = vadd.f32 %v2209_v15, %v769_v25  ;;  %v783_v62 = vadd.f32 %v2209_v15, %v770_v16  ;;  %v390_v34 = vadd.f32 %v378_v42, %v1688_v17  ;;  %v2215_v25 = vld [vmem:[#allocation24_spill] sm:$0xff] }
 0x105   : > { %v391_v8 = vadd.f32 %v379_v43, %v1691_v46  ;;  %v443_v18 = vadd.f32 %v1776_v44, %v2210_v33  ;;  %v444_v32 = vadd.f32 %v1779_v24, %v2211_v59  ;;  %v784_v60 = vadd.f32 %v2209_v15, %v771_v3 }
 0x106   : > { %v785_v6 = vadd.f32 %v2209_v15, %v772_v63  ;;  %794 = vst [vmem:[%s1957_s6 + $0x10] sm:$0xff] %v782_v9  ;;  %795 = vst [vmem:[%s1957_s6 + $0x18] sm:$0xff] %v783_v62  ;;  %v504_v17 = vmul.f32 %v2195_v36, %v327_v14  ;;  %v505_v46 = vmul.f32 %v2195_v36, %v328_v50  ;;  %v528_v44 = vrot.slane %v390_v34, 7  ;;  %v2217_v63 = vld [vmem:[#allocation14_spill] sm:$0xff] }
 0x107   : > { %v529_v4 = vrot.slane %v391_v8, 7  ;;  %796 = vst [vmem:[%s1957_s6 + $0x20] sm:$0xff] %v784_v60  ;;  %v441_v24 = vmul.f32 %v2194_v55, %v327_v14  ;;  %v442_v22 = vmul.f32 %v2194_v55, %v328_v50  ;;  %v309_v27 = vsel %vm278_vm5, %v2212_v30, %v301_v38 }
 0x108   : > { %797 = vst [vmem:[%s1957_s6 + $0x28] sm:$0xff] %v785_v6  ;;  %v315_v21 = vsel %vm278_vm5, %v301_v38, %v2212_v30  ;;  %v516_v23 = vadd.f32 %v504_v17, %v1700_v49  ;;  %v517_v5 = vadd.f32 %v505_v46, %v1703_v51  ;;  %v2213_v0 = vrot.slane %v1766_v1, 7 }
 0x109   : > { %v2214_v14 = vrot.slane %v1769_v54, 7  ;;  %v325_v43 = vsel %vm278_vm5, %v309_v27, 0.0  ;;  %v326_v49 = vsel %vm1629_vm6, %v315_v21, 0.0  ;;  %v2216_v54 = vld [vmem:[#allocation13_spill] sm:$0xff]  ;;  %v490_v9 = vadd.f32 %v2217_v63, %v1751_v40 }
 0x10a   : > { %v543_v26 = vsel %vm532_vm0, %v528_v44, %v2213_v0  ;;  %v555_v51 = vrot.slane %v516_v23, 1  ;;  %v556_v1 = vrot.slane %v517_v5, 1  ;;  %v376_v7 = vmul.f32 %v2193_v29, %v325_v43  ;;  %v2222_v5 = vld [vmem:[#allocation26_spill] sm:$0xff] }
 0x10b   : > { %v544_v50 = vsel %vm532_vm0, %v529_v4, %v2214_v14  ;;  %v731_v16 = vmul.f32 %v2215_v25, %v543_v26  ;;  %v377_v2 = vmul.f32 %v2193_v29, %v326_v49  ;;  %v489_v3 = vadd.f32 %v2216_v54, %v1748_v61 }
 0x10c   : > { %v732_v42 = vmul.f32 %v2215_v25, %v544_v50  ;;  %v2218_v13 = vrot.slane %v1788_v45, 1  ;;  %v2219_v8 = vrot.slane %v1791_v56, 1  ;;  %v388_v29 = vadd.f32 %v376_v7, %v1706_v57 }
 0x10d   : > { %v743_v62 = vadd.f32 %v731_v16, %v443_v18  ;;  %v389_v33 = vadd.f32 %v377_v2, %v1709_v58  ;;  %v453_v61 = vadd.f32 %v441_v24, %v1694_v47  ;;  %v454_v40 = vadd.f32 %v442_v22, %v1697_v48  ;;  %v2220_v18 = vld [vmem:[#allocation15_spill] sm:$0xff]  ;;  %v2221_v48 = vld [vmem:[#allocation25_spill] sm:$0xff] }
 0x10e   : > { %v744_v34 = vadd.f32 %v732_v42, %v444_v32  ;;  %v568_v37 = vsel %vm557_vm1, %v555_v51, %v2218_v13  ;;  %v569_v38 = vsel %vm557_vm1, %v556_v1, %v2219_v8  ;;  %v439_v32 = vmul.f32 %v2194_v55, %v325_v43  ;;  %v2225_v42 = vld [vmem:[#allocation27_spill] sm:$0xff] }
 0x10f   : > { %v767_v45 = vadd.f32 %v743_v62, %v2220_v18  ;;  %v440_v56 = vmul.f32 %v2194_v55, %v326_v49  ;;  %v502_v60 = vmul.f32 %v2195_v36, %v325_v43  ;;  %v503_v57 = vmul.f32 %v2195_v36, %v326_v49 }
 0x110   : > { %v768_v59 = vadd.f32 %v744_v34, %v1837_v41  ;;  %v526_v6 = vrot.slane %v388_v29, 7  ;;  %v527_v17 = vrot.slane %v389_v33, 7  ;;  %v765_v46 = vmul.f32 %v2221_v48, %v568_v37 }
 0x111   : > { %v780_v58 = vadd.f32 %v2209_v15, %v767_v45  ;;  %v766_v24 = vmul.f32 %v2221_v48, %v569_v38  ;;  %v514_v22 = vadd.f32 %v502_v60, %v489_v3  ;;  %v515_v41 = vadd.f32 %v503_v57, %v490_v9 }
 0x112   : > { %v781_v47 = vadd.f32 %v2209_v15, %v768_v59  ;;  %v533_v55 = vsel %vm532_vm0, %v526_v6, %v528_v44  ;;  %v534_v36 = vsel %vm532_vm0, %v527_v17, %v529_v4  ;;  %v535_v30 = vsel %vm532_vm0, %v524_v28, %v526_v6 }
 0x113   : > { %792 = vst [vmem:[%s1957_s6] sm:$0xff] %v780_v58  ;;  %v536_v27 = vsel %vm532_vm0, %v525_v31, %v527_v17  ;;  %v553_v21 = vrot.slane %v514_v22, 1  ;;  %v554_v23 = vrot.slane %v515_v41, 1  ;;  %v739_v0 = vmul.f32 %v2222_v5, %v535_v30 }
 0x114   : > { %793 = vst [vmem:[%s1957_s6 + $0x8] sm:$0xff] %v781_v47  ;;  %v740_v44 = vmul.f32 %v2222_v5, %v536_v27  ;;  %v451_v26 = vadd.f32 %v439_v32, %v1939_v52  ;;  %v452_v4 = vadd.f32 %v440_v56, %v1943_v39  ;;  %v753_v20 = vadd.f32 %v533_v55, %v453_v61 }
 0x115   : > { %v754_v14 = vadd.f32 %v534_v36, %v454_v40  ;;  %v558_v12 = vsel %vm557_vm1, %v553_v21, %v555_v51  ;;  %v559_v28 = vsel %vm557_vm1, %v554_v23, %v556_v1  ;;  %v2223_v31 = vrot.slane %v1862_v10, 1  ;;  %v2226_v51 = vld [vmem:[#allocation28_spill] sm:$0xff] }
 0x116   : > { %v2224_v25 = vrot.slane %v1865_v35, 1  ;;  %v751_v39 = vadd.f32 %v739_v0, %v451_v26  ;;  %v752_v16 = vadd.f32 %v740_v44, %v452_v4  ;;  %v763_v7 = vmul.f32 %v2226_v51, %v558_v12 }
 0x117   : > { %v560_v50 = vsel %vm557_vm1, %v2223_v31, %v553_v21  ;;  %v764_v1 = vmul.f32 %v2226_v51, %v559_v28  ;;  %v777_v10 = vadd.f32 %v765_v46, %v753_v20  ;;  %v778_v2 = vadd.f32 %v766_v24, %v754_v14 }
 0x118   : > { %v561_v52 = vsel %vm557_vm1, %v2224_v25, %v554_v23  ;;  %v761_v43 = vmul.f32 %v2225_v42, %v560_v50  ;;  %v775_v54 = vadd.f32 %v763_v7, %v751_v39 }
 0x119   : > { %v762_v49 = vmul.f32 %v2225_v42, %v561_v52  ;;  %v776_v3 = vadd.f32 %v764_v1, %v752_v16  ;;  %v790_v63 = vadd.f32 %v2209_v15, %v777_v10  ;;  %v791_v9 = vadd.f32 %v2209_v15, %v778_v2 }
 0x11a   : > { %v773_v19 = vadd.f32 %v761_v43, %v1931_v11 }
 0x11b   : > { %v774_v35 = vadd.f32 %v762_v49, %v1933_v53  ;;  %v788_v53 = vadd.f32 %v2209_v15, %v775_v54  ;;  %v789_v34 = vadd.f32 %v2209_v15, %v776_v3  ;;  %802 = vst [vmem:[%s1957_s6 + $0x50] sm:$0xff] %v790_v63  ;;  %803 = vst [vmem:[%s1957_s6 + $0x58] sm:$0xff] %v791_v9 }
 0x11c   : > { %v786_v62 = vadd.f32 %v2209_v15, %v773_v19 }
 0x11d   : > { %v787_v11 = vadd.f32 %v2209_v15, %v774_v35  ;;  %800 = vst [vmem:[%s1957_s6 + $0x40] sm:$0xff] %v788_v53  ;;  %801 = vst [vmem:[%s1957_s6 + $0x48] sm:$0xff] %v789_v34 }
 0x11e   : > { %798 = vst [vmem:[%s1957_s6 + $0x30] sm:$0xff] %v786_v62 }
 0x11f   : > { %799 = vst [vmem:[%s1957_s6 + $0x38] sm:$0xff] %v787_v11 }
 0x120   : > { %1050 = shalt.err (!%p1047_p1)
}
 0x121   : > { %s1051_s16 = scalar_lea.hbm %s2060_s25, 1536  ;;  %s1055_s30 = scalar_lea.hbm %s2117_s2, 3072 }
 0x122   : > { %p1052_p4 = scmp.ne.s32.totalorder %s2060_s25, %s1051_s16  ;;  %p1056_p6 = scmp.lt.s32.totalorder %s2060_s25, %s2117_s2 }
 0x123   : > { %p1057_p13 = scmp.lt.s32.totalorder %s1055_s30, %s1051_s16 }
 0x124   : > { %p1053_p11 = pnand %p1052_p4, %p2227_p0 }
 0x125   : > { %p1058_p3 = por %p1057_p13, %p1056_p6 }
 0x126   : > { %p1054_p5 = pneg %p1053_p11 }
 0x128   : > { %p1059_p12 = pnand %p1058_p3, %p1054_p5 }
 0x12a   : > { %1062 = shalt.err (!%p1059_p12)
}
 0x12b   : > { %s1116_s4 = smov 256   ;;  %s1117_s5 = smov 512  }
 0x12c   : > { %s1118_s6 = smov 16  }
 0x12d   : > { %934 = dma.vmem_to_hbm [thread:$0]  (%p2227_p0), %s2064_s14, 1536, %s2060_s25, %s805_s26, %s1116_s4, %s1117_s5, %s1118_s6  }
 0x12e PF: > { %s833_s8 = sand.u32 1, %s1093_s9   ;;  %p2228_p2 = scmp.ne.s32.totalorder %s2152_s22, 0 }
 0x12f   : > { %p2229_p7 = scmp.ge.s32.totalorder %s1105_s12, 2  ;;  %s834_s13 = scalar_lea.sflag [#allocation4], %s833_s8 }
 0x131   : > { %p945_p8 = pnand %p2229_p7, %p2228_p2 }
 0x133   : > { %p946_p9 = pneg %p945_p8 }
 0x135   : > { %1088 = dma.done.wait (%p946_p9), %s834_s13, 1536  }
 0x136   : > { %1090 = vsyncadd (%p946_p9), %s834_s13, 4294965760  ;;  %p16_p10 = scmp.ge.s32.totalorder %s1159_s15, 4   ;;  %s2230_s9 = smov %s1097_s10 }
 0x137   : > { %s2231_s10 = smov %s1101_s11  ;;  %s2232_s11 = smov %s1171_s18 }
 0x138   : > { %s2233_s12 = smov %s1159_s15  ;;  %18 = sbr.rel (!%p16_p10) target bundleno = 6 (0x6), region = 78 }
 0x13d   :  { %839 = vsyncpa [#allocation3], 1 }
 0x13e   :  { %841 = vsyncpa [#allocation3 + $0x1], 1 }
 0x13f   :  { %842 = vsyncpa [#allocation4], 1 }
 0x140   :  { %844 = vsyncpa [#allocation4 + $0x1], 1 }
 0x141   :  { %845 = vsyncpa [#allocation5], 1 }
 0x142   :  { %847 = vsyncpa [#allocation5 + $0x1], 1 }

</bundles_post_ra>
